<compile_context>
chip_gen: v7x
topology: tpu7x:2x2x1
jax: 0.10.0
libtpu: 0.0.40
codegen_flags: <defaults>
</compile_context>

<pallas_src>
import functools
import math

import jax
import jax.numpy as jnp
from jax.experimental import pallas as pl
from jax.experimental.pallas import tpu as pltpu

BN_EPS = 1e-5
FUSE_MAX_B = 1024          # whole batch in one tile -> use the fully fused kernel

# Fused-kernel parameter-slab row layout (one lane-padded slab -> one DMA).
R_A_GAMMA, R_A_BETA = 0, 1           # actor BN gamma/beta           (width A*S)
R_C_GAMMA_S, R_C_GAMMA_A = 2, 3      # critic BN gamma (state/action cols)
R_C_BETA_S, R_C_BETA_A = 4, 5        # critic BN beta  (state/action cols)
R_B0, R_B1, R_BA = 6, 7, 8           # actor biases (A*H0, A*H1, A*AD)
R_BC0, R_BH, R_BQ = 9, 10, 11        # critic biases (H0, A*H1, A)
SLAB_ROWS = 16


def _round_up(x, m):
    return ((x + m - 1) // m) * m


def _block_diag(mats):
    """[A, m, n] -> block-diagonal [A*m, A*n] (built once per param update)."""
    A, m, n = mats.shape
    eye = jnp.eye(A, dtype=mats.dtype)
    return jnp.einsum("ij,ipq->ipjq", eye, mats).reshape(A * m, A * n)


def _tile_batch(B, base=512):
    """Divisor-aware batch tiling; keep >=2 'parallel' steps for v7x dual-TC."""
    n_tiles = max((B + base - 1) // base, 1)
    if n_tiles == 1 and B >= 16:
        n_tiles = 2
    tile = _round_up((B + n_tiles - 1) // n_tiles, 8)
    return tile, n_tiles, tile * n_tiles


# --------------------------------------------------------------------------
# Kernels
# --------------------------------------------------------------------------
def fused_kernel(x_ref, w0_ref, w1_ref, wa_ref, wcs_ref, wca_ref, wh_ref, wq_ref,
                 p_ref, act_ref, q_ref, *, nb, aad):
    """Entire forward (all actors + critic) on one batch tile.

    x_ref: [Bp, A*S] state; actor weights block-diagonal over agents; the action
    / q projection weights are lane-padded to 128 so both stores are dense.
    BatchNorm batch stats (biased var) are computed in-kernel, masked over the
    `nb` valid rows.
    """
    AS = x_ref.shape[-1]
    AH0 = w0_ref.shape[-1]
    AH1 = w1_ref.shape[-1]
    H0 = wcs_ref.shape[-1]
    Bp = x_ref.shape[0]
    OA = wa_ref.shape[-1]        # lane-padded action width (>= aad)
    OQ = wq_ref.shape[-1]        # lane-padded q width

    inv_n = 1.0 / nb
    x = x_ref[...]

    if Bp != nb:
        rows = jax.lax.broadcasted_iota(jnp.int32, (Bp, 1), 0)
        valid = rows < nb
    else:
        valid = None

    # ---- batch stats over state columns (shared by actor BN & critic BN) ----
    xm = x if valid is None else jnp.where(valid, x, 0.0)
    mean_s = jnp.sum(xm, axis=0, keepdims=True) * inv_n
    ds = x - mean_s
    if valid is not None:
        ds = jnp.where(valid, ds, 0.0)
    var_s = jnp.sum(ds * ds, axis=0, keepdims=True) * inv_n        # biased
    inv_std_s = jax.lax.rsqrt(var_s + BN_EPS)

    # ---- actors (block-diagonal fused over agents) ----
    sc = p_ref[R_A_GAMMA:R_A_GAMMA + 1, :AS] * inv_std_s
    xa = x * sc + (p_ref[R_A_BETA:R_A_BETA + 1, :AS] - mean_s * sc)
    h = jnp.maximum(jnp.dot(xa, w0_ref[...], preferred_element_type=jnp.float32)
                    + p_ref[R_B0:R_B0 + 1, :AH0], 0.0)
    h = jnp.maximum(jnp.dot(h, w1_ref[...], preferred_element_type=jnp.float32)
                    + p_ref[R_B1:R_B1 + 1, :AH1], 0.0)
    act_full = jnp.tanh(jnp.dot(h, wa_ref[...], preferred_element_type=jnp.float32)
                        + p_ref[R_BA:R_BA + 1, :OA])   # lanes >= aad are tanh(0)=0
    act_ref[...] = act_full                            # dense (unmasked) store
    act = act_full[:, :aad]

    # ---- critic BN stats over action columns (masked for padded rows) ----
    am = act if valid is None else jnp.where(valid, act, 0.0)
    mean_a = jnp.sum(am, axis=0, keepdims=True) * inv_n
    da = act - mean_a
    if valid is not None:
        da = jnp.where(valid, da, 0.0)
    var_a = jnp.sum(da * da, axis=0, keepdims=True) * inv_n
    inv_std_a = jax.lax.rsqrt(var_a + BN_EPS)

    sc_s = p_ref[R_C_GAMMA_S:R_C_GAMMA_S + 1, :AS] * inv_std_s
    xs_n = x * sc_s + (p_ref[R_C_BETA_S:R_C_BETA_S + 1, :AS] - mean_s * sc_s)
    sc_a = p_ref[R_C_GAMMA_A:R_C_GAMMA_A + 1, :aad] * inv_std_a
    xa_n = act * sc_a + (p_ref[R_C_BETA_A:R_C_BETA_A + 1, :aad] - mean_a * sc_a)

    # Critic first layer split over state/action columns (avoids a lane concat).
    hc = jnp.maximum(
        jnp.dot(xs_n, wcs_ref[...], preferred_element_type=jnp.float32)
        + jnp.dot(xa_n, wca_ref[...], preferred_element_type=jnp.float32)
        + p_ref[R_BC0:R_BC0 + 1, :H0], 0.0)
    hh = jnp.maximum(jnp.dot(hc, wh_ref[...], preferred_element_type=jnp.float32)
                     + p_ref[R_BH:R_BH + 1, :AH1], 0.0)
    q_ref[...] = (jnp.dot(hh, wq_ref[...], preferred_element_type=jnp.float32)
                  + p_ref[R_BQ:R_BQ + 1, :OQ])         # dense store, lanes >= A are 0


def actor_kernel(x_ref, w0_ref, w1_ref, wa_ref, bn_ref, b_ref, out_ref):
    """Tiled large-batch actor path (all agents fused via block-diag weights).
    bn_ref rows: 0 scale, 1 shift.  b_ref rows: 0 b0, 1 b1, 2 ba."""
    AS = x_ref.shape[-1]
    AH0 = w0_ref.shape[-1]
    AH1 = w1_ref.shape[-1]
    OA = wa_ref.shape[-1]
    x = x_ref[...] * bn_ref[0:1, :AS] + bn_ref[1:2, :AS]
    x = jnp.maximum(jnp.dot(x, w0_ref[...], preferred_element_type=jnp.float32)
                    + b_ref[0:1, :AH0], 0.0)
    x = jnp.maximum(jnp.dot(x, w1_ref[...], preferred_element_type=jnp.float32)
                    + b_ref[1:2, :AH1], 0.0)
    out_ref[...] = jnp.tanh(jnp.dot(x, wa_ref[...], preferred_element_type=jnp.float32)
                            + b_ref[2:3, :OA])


def critic_kernel(x_ref, wc_ref, wh_ref, wq_ref, bn_ref, b_ref, q_ref):
    """Tiled large-batch critic path.  bn_ref rows: 0 scale, 1 shift.
    b_ref rows: 0 bc0, 1 b_heads, 2 b_q."""
    D = x_ref.shape[-1]
    H0 = wc_ref.shape[-1]
    AH1 = wh_ref.shape[-1]
    OQ = wq_ref.shape[-1]
    x = x_ref[...] * bn_ref[0:1, :D] + bn_ref[1:2, :D]
    x = jnp.maximum(jnp.dot(x, wc_ref[...], preferred_element_type=jnp.float32)
                    + b_ref[0:1, :H0], 0.0)
    h = jnp.maximum(jnp.dot(x, wh_ref[...], preferred_element_type=jnp.float32)
                    + b_ref[1:2, :AH1], 0.0)
    q_ref[...] = (jnp.dot(h, wq_ref[...], preferred_element_type=jnp.float32)
                  + b_ref[2:3, :OQ])


# --------------------------------------------------------------------------
# One-time parameter packing (outside the hot path; per parameter update)
# --------------------------------------------------------------------------
def prepare_params(ap, cp):
    A, S, H0 = ap["w0"].shape
    H1 = ap["w1"].shape[-1]
    AD = ap["wa"].shape[-1]
    AS, AH0, AH1, AAD = A * S, A * H0, A * H1, A * AD
    D = AS + AAD
    OA = _round_up(AAD, 128)          # lane-dense action output width
    OQ = _round_up(A, 128)            # lane-dense q output width
    P = _round_up(max(AS, AH0, AH1, H0, D, OA, OQ), 128)

    w0f = _block_diag(ap["w0"])                                        # [AS, AH0]
    w1f = _block_diag(ap["w1"])                                        # [AH0, AH1]
    waf = jnp.zeros((AH1, OA), jnp.float32).at[:, :AAD].set(_block_diag(ap["wa"]))
    wh = jnp.transpose(cp["w_heads"], (1, 0, 2)).reshape(H0, AH1)      # fused heads
    bh = cp["b_heads"].reshape(AH1)
    wqf = jnp.zeros((AH1, OQ), jnp.float32).at[:, :A].set(
        _block_diag(cp["w_q"][:, :, None]))                            # block-diag q proj

    slab = jnp.zeros((SLAB_ROWS, P), jnp.float32)
    slab = slab.at[R_A_GAMMA, :AS].set(ap["gamma"].reshape(AS))
    slab = slab.at[R_A_BETA, :AS].set(ap["beta"].reshape(AS))
    slab = slab.at[R_C_GAMMA_S, :AS].set(cp["gamma"][:AS])
    slab = slab.at[R_C_GAMMA_A, :AAD].set(cp["gamma"][AS:])
    slab = slab.at[R_C_BETA_S, :AS].set(cp["beta"][:AS])
    slab = slab.at[R_C_BETA_A, :AAD].set(cp["beta"][AS:])
    slab = slab.at[R_B0, :AH0].set(ap["b0"].reshape(AH0))
    slab = slab.at[R_B1, :AH1].set(ap["b1"].reshape(AH1))
    slab = slab.at[R_BA, :AAD].set(ap["ba"].reshape(AAD))
    slab = slab.at[R_BC0, :H0].set(cp["bc0"])
    slab = slab.at[R_BH, :AH1].set(bh)
    slab = slab.at[R_BQ, :A].set(cp["b_q"])

    actor_bias = jnp.zeros((8, P), jnp.float32)
    actor_bias = actor_bias.at[0, :AH0].set(ap["b0"].reshape(AH0))
    actor_bias = actor_bias.at[1, :AH1].set(ap["b1"].reshape(AH1))
    actor_bias = actor_bias.at[2, :AAD].set(ap["ba"].reshape(AAD))

    critic_bias = jnp.zeros((8, P), jnp.float32)
    critic_bias = critic_bias.at[0, :H0].set(cp["bc0"])
    critic_bias = critic_bias.at[1, :AH1].set(bh)
    critic_bias = critic_bias.at[2, :A].set(cp["b_q"])

    return dict(
        dims=(A, S, AD, H0, H1), P=P,
        w0f=w0f, w1f=w1f, waf=waf,
        wc0=cp["wc0"], wc0_s=cp["wc0"][:AS], wc0_a=cp["wc0"][AS:],
        wh=wh, wqf=wqf, slab=slab,
        actor_gamma=ap["gamma"].reshape(AS), actor_beta=ap["beta"].reshape(AS),
        critic_gamma=cp["gamma"], critic_beta=cp["beta"],
        actor_bias=actor_bias, critic_bias=critic_bias,
    )


# --------------------------------------------------------------------------
# Wrappers
# --------------------------------------------------------------------------
def maddpg_forward_fused(state, pp):
    """Single pallas_call computing actions and q (batch fits one tile)."""
    A, S, AD, H0, H1 = pp["dims"]
    B = state.shape[0]
    AS, AAD = A * S, A * AD
    AH0, AH1 = A * H0, A * H1
    P = pp["P"]
    x = state.reshape(B, AS)                      # contiguous, no transpose
    Bp = _round_up(max(B, 8), 8)
    if Bp != B:
        x = jnp.pad(x, ((0, Bp - B), (0, 0)))

    OA = pp["waf"].shape[-1]
    OQ = pp["wqf"].shape[-1]
    act, q = pl.pallas_call(
        functools.partial(fused_kernel, nb=B, aad=AAD),
        out_shape=(jax.ShapeDtypeStruct((Bp, OA), jnp.float32),
                   jax.ShapeDtypeStruct((Bp, OQ), jnp.float32)),
        grid=(1,),
        in_specs=[
            pl.BlockSpec((Bp, AS), lambda i: (0, 0)),
            pl.BlockSpec((AS, AH0), lambda i: (0, 0)),
            pl.BlockSpec((AH0, AH1), lambda i: (0, 0)),
            pl.BlockSpec((AH1, OA), lambda i: (0, 0)),
            pl.BlockSpec((AS, H0), lambda i: (0, 0)),
            pl.BlockSpec((AAD, H0), lambda i: (0, 0)),
            pl.BlockSpec((H0, AH1), lambda i: (0, 0)),
            pl.BlockSpec((AH1, OQ), lambda i: (0, 0)),
            pl.BlockSpec((SLAB_ROWS, P), lambda i: (0, 0)),
        ],
        out_specs=(pl.BlockSpec((Bp, OA), lambda i: (0, 0)),
                   pl.BlockSpec((Bp, OQ), lambda i: (0, 0))),
        compiler_params=pltpu.CompilerParams(dimension_semantics=("arbitrary",)),
    )(x, pp["w0f"], pp["w1f"], pp["waf"], pp["wc0_s"], pp["wc0_a"],
      pp["wh"], pp["wqf"], pp["slab"])
    return act[:B, :AAD].reshape(B, A, AD), q[:B, :A]


def maddpg_act(state, pp):
    """Tiled actor path: state [B, A, S] -> actions [B, A, AD]."""
    A, S, AD, H0, H1 = pp["dims"]
    B = state.shape[0]
    AS, AAD = A * S, A * AD
    AH0, AH1 = A * H0, A * H1
    P = pp["P"]
    x = state.reshape(B, AS)

    # BatchNorm1d training-mode batch stats (single pass, biased var), folded.
    mean = jnp.mean(x, axis=0)
    var = jnp.maximum(jnp.mean(x * x, axis=0) - mean * mean, 0.0)
    scale = pp["actor_gamma"] * jax.lax.rsqrt(var + BN_EPS)
    shift = pp["actor_beta"] - mean * scale
    bn = jnp.zeros((8, P), jnp.float32).at[0, :AS].set(scale).at[1, :AS].set(shift)

    tile, n_tiles, Bp = _tile_batch(B)
    if Bp != B:
        x = jnp.pad(x, ((0, Bp - B), (0, 0)))

    OA = pp["waf"].shape[-1]
    out = pl.pallas_call(
        actor_kernel,
        out_shape=jax.ShapeDtypeStruct((Bp, OA), jnp.float32),
        grid=(n_tiles,),
        in_specs=[
            pl.BlockSpec((tile, AS), lambda b: (b, 0)),
            pl.BlockSpec((AS, AH0), lambda b: (0, 0)),
            pl.BlockSpec((AH0, AH1), lambda b: (0, 0)),
            pl.BlockSpec((AH1, OA), lambda b: (0, 0)),
            pl.BlockSpec((8, P), lambda b: (0, 0)),
            pl.BlockSpec((8, P), lambda b: (0, 0)),
        ],
        out_specs=pl.BlockSpec((tile, OA), lambda b: (b, 0)),
        compiler_params=pltpu.CompilerParams(dimension_semantics=("parallel",)),
    )(x, pp["w0f"], pp["w1f"], pp["waf"], bn, pp["actor_bias"])
    return out[:B, :AAD].reshape(B, A, AD)


def maddpg_q(state_flat, action_flat, pp):
    """Tiled critic path: [B, A*S], [B, A*AD] -> q [B, A]."""
    A, S, AD, H0, H1 = pp["dims"]
    AH1 = A * H1
    P = pp["P"]
    x = jnp.concatenate([state_flat, action_flat], axis=1)   # torch.cat(dim=1)
    B, D = x.shape

    mean = jnp.mean(x, axis=0)
    var = jnp.maximum(jnp.mean(x * x, axis=0) - mean * mean, 0.0)
    scale = pp["critic_gamma"] * jax.lax.rsqrt(var + BN_EPS)
    shift = pp["critic_beta"] - mean * scale
    bn = jnp.zeros((8, P), jnp.float32).at[0, :D].set(scale).at[1, :D].set(shift)

    tile, n_tiles, Bp = _tile_batch(B)
    if Bp != B:
        x = jnp.pad(x, ((0, Bp - B), (0, 0)))

    OQ = pp["wqf"].shape[-1]
    q = pl.pallas_call(
        critic_kernel,
        out_shape=jax.ShapeDtypeStruct((Bp, OQ), jnp.float32),
        grid=(n_tiles,),
        in_specs=[
            pl.BlockSpec((tile, D), lambda b: (b, 0)),
            pl.BlockSpec((D, H0), lambda b: (0, 0)),
            pl.BlockSpec((H0, AH1), lambda b: (0, 0)),
            pl.BlockSpec((AH1, OQ), lambda b: (0, 0)),
            pl.BlockSpec((8, P), lambda b: (0, 0)),
            pl.BlockSpec((8, P), lambda b: (0, 0)),
        ],
        out_specs=pl.BlockSpec((tile, OQ), lambda b: (b, 0)),
        compiler_params=pltpu.CompilerParams(dimension_semantics=("parallel",)),
    )(x, pp["wc0"], pp["wh"], pp["wqf"], bn, pp["critic_bias"])
    return q[:B, :A]


def maddpg_forward(state, pp):
    B = state.shape[0]
    if B <= FUSE_MAX_B:
        return maddpg_forward_fused(state, pp)
    A, S, AD, _, _ = pp["dims"]
    actions = maddpg_act(state, pp)
    q = maddpg_q(state.reshape(B, A * S), actions.reshape(B, A * AD), pp)
    return actions, q


# --------------------------------------------------------------------------
# Parameter init (matches PyTorch: xavier_uniform_ weights, default bias init,
# fresh BatchNorm1d gamma=1 / beta=0).  Weights stored as [in, out].
# --------------------------------------------------------------------------
def _xavier(key, fan_in, fan_out):
    bound = math.sqrt(6.0 / (fan_in + fan_out))
    return jax.random.uniform(key, (fan_in, fan_out), jnp.float32, -bound, bound)


def _bias(key, fan_in, fan_out):
    bound = 1.0 / math.sqrt(fan_in)
    return jax.random.uniform(key, (fan_out,), jnp.float32, -bound, bound)


def init_params(key, num_agents, state_dim, action_dim, hidden_size):
    assert len(hidden_size) == 2, "kernels are written for two hidden layers"
    h0, h1 = hidden_size
    keys = jax.random.split(key, num_agents + 1)

    a_w0, a_b0, a_w1, a_b1, a_wa, a_ba = [], [], [], [], [], []
    for i in range(num_agents):
        ks = jax.random.split(keys[i], 6)
        a_w0.append(_xavier(ks[0], state_dim, h0)); a_b0.append(_bias(ks[1], state_dim, h0))
        a_w1.append(_xavier(ks[2], h0, h1));        a_b1.append(_bias(ks[3], h0, h1))
        a_wa.append(_xavier(ks[4], h1, action_dim)); a_ba.append(_bias(ks[5], h1, action_dim))
    actor_params = {
        "gamma": jnp.ones((num_agents, state_dim), jnp.float32),
        "beta": jnp.zeros((num_agents, state_dim), jnp.float32),
        "w0": jnp.stack(a_w0), "b0": jnp.stack(a_b0),
        "w1": jnp.stack(a_w1), "b1": jnp.stack(a_b1),
        "wa": jnp.stack(a_wa), "ba": jnp.stack(a_ba),
    }

    D = (state_dim + action_dim) * num_agents
    ck = jax.random.split(keys[-1], 2 + 4 * num_agents)
    wc0 = _xavier(ck[0], D, h0)
    bc0 = _bias(ck[1], D, h0)
    w_heads, b_heads, w_q, b_q = [], [], [], []
    for i in range(num_agents):
        base = 2 + 4 * i
        w_heads.append(_xavier(ck[base + 0], h0, h1))
        b_heads.append(_bias(ck[base + 1], h0, h1))
        w_q.append(_xavier(ck[base + 2], h1, 1)[:, 0])
        b_q.append(_bias(ck[base + 3], h1, 1)[0])
    critic_params = {
        "gamma": jnp.ones((D,), jnp.float32),
        "beta": jnp.zeros((D,), jnp.float32),
        "wc0": wc0, "bc0": bc0,
        "w_heads": jnp.stack(w_heads), "b_heads": jnp.stack(b_heads),
        "w_q": jnp.stack(w_q), "b_q": jnp.stack(b_q),
    }
    return actor_params, critic_params


# --------------------------------------------------------------------------
# Pure-JAX references (mirror the PyTorch module directly, unfused)
# --------------------------------------------------------------------------
def reference_act(state, ap):
    outs = []
    for i in range(state.shape[1]):
        x = state[:, i, :]
        mean = jnp.mean(x, axis=0)
        var = jnp.mean(jnp.square(x - mean), axis=0)
        x = (x - mean) / jnp.sqrt(var + BN_EPS) * ap["gamma"][i] + ap["beta"][i]
        x = jnp.maximum(x @ ap["w0"][i] + ap["b0"][i], 0.0)
        x = jnp.maximum(x @ ap["w1"][i] + ap["b1"][i], 0.0)
        outs.append(jnp.tanh(x @ ap["wa"][i] + ap["ba"][i]))
    return jnp.stack(outs, axis=1)


def reference_q(state_flat, action_flat, cp):
    x = jnp.concatenate([state_flat, action_flat], axis=1)
    mean = jnp.mean(x, axis=0)
    var = jnp.mean(jnp.square(x - mean), axis=0)
    x = (x - mean) / jnp.sqrt(var + BN_EPS) * cp["gamma"] + cp["beta"]
    x = jnp.maximum(x @ cp["wc0"] + cp["bc0"], 0.0)
    qs = []
    for i in range(cp["w_heads"].shape[0]):
        h = jnp.maximum(x @ cp["w_heads"][i] + cp["b_heads"][i], 0.0)
        qs.append(h @ cp["w_q"][i] + cp["b_q"][i])
    return jnp.stack(qs, axis=-1)


# --------------------------------------------------------------------------
if __name__ == "__main__":
    B, NUM_AGENTS, STATE_DIM, ACTION_DIM, HIDDEN = 8, 2, 16, 4, (32, 32)

    root = jax.random.PRNGKey(0)
    k_state, k_params, k_state2, k_state3 = jax.random.split(root, 4)

    actor_params, critic_params = init_params(
        k_params, NUM_AGENTS, STATE_DIM, ACTION_DIM, HIDDEN)
    packed = prepare_params(actor_params, critic_params)   # once per param update

    # --- primary demo: act + Q in ONE fused pallas_call ---
    state = jax.random.normal(k_state, (B, NUM_AGENTS, STATE_DIM), jnp.float32)
    actions, q = maddpg_forward(state, packed)
    jax.block_until_ready((actions, q))

    assert actions.shape == (B, NUM_AGENTS, ACTION_DIM)
    assert q.shape == (B, NUM_AGENTS)
    assert bool(jnp.all(jnp.isfinite(actions))) and bool(jnp.all(jnp.isfinite(q)))

    ref_actions = reference_act(state, actor_params)
    ref_q = reference_q(state.reshape(B, -1), ref_actions.reshape(B, -1), critic_params)
    assert bool(jnp.allclose(actions, ref_actions, atol=2e-2, rtol=1e-2)), "fused act mismatch"
    assert bool(jnp.allclose(q, ref_q, atol=2e-2, rtol=1e-2)), "fused Q mismatch"

    # --- fused path with batch padding (exercises in-kernel masked BN stats) ---
    B2 = 13
    state2 = jax.random.normal(k_state2, (B2, NUM_AGENTS, STATE_DIM), jnp.float32)
    a2, q2 = maddpg_forward_fused(state2, packed)
    ra2 = reference_act(state2, actor_params)
    rq2 = reference_q(state2.reshape(B2, -1), ra2.reshape(B2, -1), critic_params)
    assert bool(jnp.allclose(a2, ra2, atol=2e-2, rtol=1e-2)), "fused(pad) act mismatch"
    assert bool(jnp.allclose(q2, rq2, atol=2e-2, rtol=1e-2)), "fused(pad) Q mismatch"

    # --- large-batch tiled path (separate actor / critic kernels) ---
    B3 = 300
    state3 = jax.random.normal(k_state3, (B3, NUM_AGENTS, STATE_DIM), jnp.float32)
    a3 = maddpg_act(state3, packed)
    q3 = maddpg_q(state3.reshape(B3, -1), a3.reshape(B3, -1), packed)
    jax.block_until_ready((a3, q3))
    ra3 = reference_act(state3, actor_params)
    rq3 = reference_q(state3.reshape(B3, -1), a3.reshape(B3, -1), critic_params)
    assert bool(jnp.allclose(a3, ra3, atol=2e-2, rtol=1e-2)), "tiled act mismatch"
    assert bool(jnp.allclose(q3, rq3, atol=2e-2, rtol=1e-2)), "tiled Q mismatch"

    print("KERNEL_OK")
</pallas_src>

<mosaic_0001>
module attributes {stable_mosaic.version = 11 : i64} {
  func.func @fused_kernel(%arg0: i32, %arg1: memref<8x32xf32, #tpu.memory_space<vmem>>, %arg2: memref<32x64xf32, #tpu.memory_space<vmem>>, %arg3: memref<64x64xf32, #tpu.memory_space<vmem>>, %arg4: memref<64x128xf32, #tpu.memory_space<vmem>>, %arg5: memref<32x32xf32, #tpu.memory_space<vmem>>, %arg6: memref<8x32xf32, #tpu.memory_space<vmem>>, %arg7: memref<32x64xf32, #tpu.memory_space<vmem>>, %arg8: memref<64x128xf32, #tpu.memory_space<vmem>>, %arg9: memref<16x128xf32, #tpu.memory_space<vmem>>, %arg10: memref<8x128xf32, #tpu.memory_space<vmem>>, %arg11: memref<8x128xf32, #tpu.memory_space<vmem>>) attributes {dimension_semantics = [#tpu.dimension_semantics<arbitrary>], iteration_bounds = array<i64: 1>, scalar_prefetch = 0 : i64, scratch_operands = 0 : i64, tpu.core_type = #tpu.core_type<tc>, window_params = [{pipeline_mode = #tpu.pipeline_mode<synchronous>, transform_indices = @transform_0, window_bounds = array<i64: 8, 32>}, {pipeline_mode = #tpu.pipeline_mode<synchronous>, transform_indices = @transform_1, window_bounds = array<i64: 32, 64>}, {pipeline_mode = #tpu.pipeline_mode<synchronous>, transform_indices = @transform_2, window_bounds = array<i64: 64, 64>}, {pipeline_mode = #tpu.pipeline_mode<synchronous>, transform_indices = @transform_3, window_bounds = array<i64: 64, 128>}, {pipeline_mode = #tpu.pipeline_mode<synchronous>, transform_indices = @transform_4, window_bounds = array<i64: 32, 32>}, {pipeline_mode = #tpu.pipeline_mode<synchronous>, transform_indices = @transform_5, window_bounds = array<i64: 8, 32>}, {pipeline_mode = #tpu.pipeline_mode<synchronous>, transform_indices = @transform_6, window_bounds = array<i64: 32, 64>}, {pipeline_mode = #tpu.pipeline_mode<synchronous>, transform_indices = @transform_7, window_bounds = array<i64: 64, 128>}, {pipeline_mode = #tpu.pipeline_mode<synchronous>, transform_indices = @transform_8, window_bounds = array<i64: 16, 128>}, {pipeline_mode = #tpu.pipeline_mode<synchronous>, transform_indices = @transform_9, window_bounds = array<i64: 8, 128>}, {pipeline_mode = #tpu.pipeline_mode<synchronous>, transform_indices = @transform_10, window_bounds = array<i64: 8, 128>}]} {
    %c0 = arith.constant 0 : index
    %c0_0 = arith.constant 0 : index
    %0 = vector.load %arg1[%c0, %c0_0] : memref<8x32xf32, #tpu.memory_space<vmem>>, vector<8x32xf32>
    %cst = arith.constant dense<0.000000e+00> : vector<32xf32>
    %1 = vector.multi_reduction <add>, %0, %cst [0] : vector<8x32xf32> to vector<32xf32>
    %2 = vector.shape_cast %1 : vector<32xf32> to vector<1x32xf32>
    %cst_1 = arith.constant 1.250000e-01 : f32
    %3 = vector.broadcast %cst_1 : f32 to vector<1x32xf32>
    %4 = arith.mulf %2, %3 : vector<1x32xf32>
    %5 = vector.broadcast %4 : vector<1x32xf32> to vector<8x32xf32>
    %6 = arith.subf %0, %5 : vector<8x32xf32>
    %7 = arith.mulf %6, %6 : vector<8x32xf32>
    %cst_2 = arith.constant dense<0.000000e+00> : vector<32xf32>
    %8 = vector.multi_reduction <add>, %7, %cst_2 [0] : vector<8x32xf32> to vector<32xf32>
    %9 = vector.shape_cast %8 : vector<32xf32> to vector<1x32xf32>
    %cst_3 = arith.constant 1.250000e-01 : f32
    %10 = vector.broadcast %cst_3 : f32 to vector<1x32xf32>
    %11 = arith.mulf %9, %10 : vector<1x32xf32>
    %cst_4 = arith.constant 9.99999974E-6 : f32
    %12 = vector.broadcast %cst_4 : f32 to vector<1x32xf32>
    %13 = arith.addf %11, %12 : vector<1x32xf32>
    %14 = math.rsqrt %13 : vector<1x32xf32>
    %c0_5 = arith.constant 0 : index
    %c0_6 = arith.constant 0 : index
    %15 = vector.load %arg9[%c0_5, %c0_6] : memref<16x128xf32, #tpu.memory_space<vmem>>, vector<1x32xf32>
    %16 = arith.mulf %15, %14 : vector<1x32xf32>
    %17 = vector.broadcast %16 : vector<1x32xf32> to vector<8x32xf32>
    %18 = arith.mulf %0, %17 : vector<8x32xf32>
    %c1 = arith.constant 1 : index
    %c0_7 = arith.constant 0 : index
    %19 = vector.load %arg9[%c1, %c0_7] : memref<16x128xf32, #tpu.memory_space<vmem>>, vector<1x32xf32>
    %20 = arith.mulf %4, %16 : vector<1x32xf32>
    %21 = arith.subf %19, %20 : vector<1x32xf32>
    %22 = vector.broadcast %21 : vector<1x32xf32> to vector<8x32xf32>
    %23 = arith.addf %18, %22 : vector<8x32xf32>
    %c0_8 = arith.constant 0 : index
    %c0_9 = arith.constant 0 : index
    %24 = vector.load %arg2[%c0_8, %c0_9] : memref<32x64xf32, #tpu.memory_space<vmem>>, vector<32x64xf32>
    %cst_10 = arith.constant dense<0.000000e+00> : vector<8x64xf32>
    %25 = tpu.matmul %23, %24, %cst_10 {dimension_numbers = #tpu.dot_dimension_numbers<[1], [0], [0], [1], [0, 0, 1, 1], [], []>} : vector<8x32xf32>, vector<32x64xf32>, vector<8x64xf32> -> vector<8x64xf32>
    %c6 = arith.constant 6 : index
    %c0_11 = arith.constant 0 : index
    %26 = vector.load %arg9[%c6, %c0_11] : memref<16x128xf32, #tpu.memory_space<vmem>>, vector<1x64xf32>
    %27 = vector.broadcast %26 : vector<1x64xf32> to vector<8x64xf32>
    %28 = arith.addf %25, %27 : vector<8x64xf32>
    %cst_12 = arith.constant 0.000000e+00 : f32
    %29 = vector.broadcast %cst_12 : f32 to vector<8x64xf32>
    %30 = arith.maximumf %28, %29 : vector<8x64xf32>
    %c0_13 = arith.constant 0 : index
    %c0_14 = arith.constant 0 : index
    %31 = vector.load %arg3[%c0_13, %c0_14] : memref<64x64xf32, #tpu.memory_space<vmem>>, vector<64x64xf32>
    %cst_15 = arith.constant dense<0.000000e+00> : vector<8x64xf32>
    %32 = tpu.matmul %30, %31, %cst_15 {dimension_numbers = #tpu.dot_dimension_numbers<[1], [0], [0], [1], [0, 0, 1, 1], [], []>} : vector<8x64xf32>, vector<64x64xf32>, vector<8x64xf32> -> vector<8x64xf32>
    %c7 = arith.constant 7 : index
    %c0_16 = arith.constant 0 : index
    %33 = vector.load %arg9[%c7, %c0_16] : memref<16x128xf32, #tpu.memory_space<vmem>>, vector<1x64xf32>
    %34 = vector.broadcast %33 : vector<1x64xf32> to vector<8x64xf32>
    %35 = arith.addf %32, %34 : vector<8x64xf32>
    %cst_17 = arith.constant 0.000000e+00 : f32
    %36 = vector.broadcast %cst_17 : f32 to vector<8x64xf32>
    %37 = arith.maximumf %35, %36 : vector<8x64xf32>
    %c0_18 = arith.constant 0 : index
    %c0_19 = arith.constant 0 : index
    %38 = vector.load %arg4[%c0_18, %c0_19] : memref<64x128xf32, #tpu.memory_space<vmem>>, vector<64x128xf32>
    %cst_20 = arith.constant dense<0.000000e+00> : vector<8x128xf32>
    %39 = tpu.matmul %37, %38, %cst_20 {dimension_numbers = #tpu.dot_dimension_numbers<[1], [0], [0], [1], [0, 0, 1, 1], [], []>} : vector<8x64xf32>, vector<64x128xf32>, vector<8x128xf32> -> vector<8x128xf32>
    %c8 = arith.constant 8 : index
    %c0_21 = arith.constant 0 : index
    %40 = vector.load %arg9[%c8, %c0_21] : memref<16x128xf32, #tpu.memory_space<vmem>>, vector<1x128xf32>
    %41 = vector.broadcast %40 : vector<1x128xf32> to vector<8x128xf32>
    %42 = arith.addf %39, %41 : vector<8x128xf32>
    %43 = math.tanh %42 : vector<8x128xf32>
    %c0_22 = arith.constant 0 : index
    %c0_23 = arith.constant 0 : index
    %44 = vector.load %arg10[%c0_22, %c0_23] : memref<8x128xf32, #tpu.memory_space<vmem>>, vector<8x128xf32>
    tpu.vector_store %arg10[%c0_22, %c0_23], %43 {strides = array<i32>} : memref<8x128xf32, #tpu.memory_space<vmem>>, vector<8x128xf32>,
    %45 = vector.extract_strided_slice %43 {offsets = [0, 0], sizes = [8, 8], strides = [1, 1]} : vector<8x128xf32> to vector<8x8xf32>
    %cst_24 = arith.constant dense<0.000000e+00> : vector<8xf32>
    %46 = vector.multi_reduction <add>, %45, %cst_24 [0] : vector<8x8xf32> to vector<8xf32>
    %47 = vector.shape_cast %46 : vector<8xf32> to vector<1x8xf32>
    %cst_25 = arith.constant 1.250000e-01 : f32
    %48 = vector.broadcast %cst_25 : f32 to vector<1x8xf32>
    %49 = arith.mulf %47, %48 : vector<1x8xf32>
    %50 = vector.broadcast %49 : vector<1x8xf32> to vector<8x8xf32>
    %51 = arith.subf %45, %50 : vector<8x8xf32>
    %52 = arith.mulf %51, %51 : vector<8x8xf32>
    %cst_26 = arith.constant dense<0.000000e+00> : vector<8xf32>
    %53 = vector.multi_reduction <add>, %52, %cst_26 [0] : vector<8x8xf32> to vector<8xf32>
    %54 = vector.shape_cast %53 : vector<8xf32> to vector<1x8xf32>
    %cst_27 = arith.constant 1.250000e-01 : f32
    %55 = vector.broadcast %cst_27 : f32 to vector<1x8xf32>
    %56 = arith.mulf %54, %55 : vector<1x8xf32>
    %cst_28 = arith.constant 9.99999974E-6 : f32
    %57 = vector.broadcast %cst_28 : f32 to vector<1x8xf32>
    %58 = arith.addf %56, %57 : vector<1x8xf32>
    %59 = math.rsqrt %58 : vector<1x8xf32>
    %c2 = arith.constant 2 : index
    %c0_29 = arith.constant 0 : index
    %60 = vector.load %arg9[%c2, %c0_29] : memref<16x128xf32, #tpu.memory_space<vmem>>, vector<1x32xf32>
    %61 = arith.mulf %60, %14 : vector<1x32xf32>
    %62 = vector.broadcast %61 : vector<1x32xf32> to vector<8x32xf32>
    %63 = arith.mulf %0, %62 : vector<8x32xf32>
    %c4 = arith.constant 4 : index
    %c0_30 = arith.constant 0 : index
    %64 = vector.load %arg9[%c4, %c0_30] : memref<16x128xf32, #tpu.memory_space<vmem>>, vector<1x32xf32>
    %65 = arith.mulf %4, %61 : vector<1x32xf32>
    %66 = arith.subf %64, %65 : vector<1x32xf32>
    %67 = vector.broadcast %66 : vector<1x32xf32> to vector<8x32xf32>
    %68 = arith.addf %63, %67 : vector<8x32xf32>
    %c3 = arith.constant 3 : index
    %c0_31 = arith.constant 0 : index
    %69 = vector.load %arg9[%c3, %c0_31] : memref<16x128xf32, #tpu.memory_space<vmem>>, vector<1x8xf32>
    %70 = arith.mulf %69, %59 : vector<1x8xf32>
    %71 = vector.broadcast %70 : vector<1x8xf32> to vector<8x8xf32>
    %72 = arith.mulf %45, %71 : vector<8x8xf32>
    %c5 = arith.constant 5 : index
    %c0_32 = arith.constant 0 : index
    %73 = vector.load %arg9[%c5, %c0_32] : memref<16x128xf32, #tpu.memory_space<vmem>>, vector<1x8xf32>
    %74 = arith.mulf %49, %70 : vector<1x8xf32>
    %75 = arith.subf %73, %74 : vector<1x8xf32>
    %76 = vector.broadcast %75 : vector<1x8xf32> to vector<8x8xf32>
    %77 = arith.addf %72, %76 : vector<8x8xf32>
    %c0_33 = arith.constant 0 : index
    %c0_34 = arith.constant 0 : index
    %78 = vector.load %arg5[%c0_33, %c0_34] : memref<32x32xf32, #tpu.memory_space<vmem>>, vector<32x32xf32>
    %cst_35 = arith.constant dense<0.000000e+00> : vector<8x32xf32>
    %79 = tpu.matmul %68, %78, %cst_35 {dimension_numbers = #tpu.dot_dimension_numbers<[1], [0], [0], [1], [0, 0, 1, 1], [], []>} : vector<8x32xf32>, vector<32x32xf32>, vector<8x32xf32> -> vector<8x32xf32>
    %c0_36 = arith.constant 0 : index
    %c0_37 = arith.constant 0 : index
    %80 = vector.load %arg6[%c0_36, %c0_37] : memref<8x32xf32, #tpu.memory_space<vmem>>, vector<8x32xf32>
    %cst_38 = arith.constant dense<0.000000e+00> : vector<8x32xf32>
    %81 = tpu.matmul %77, %80, %cst_38 {dimension_numbers = #tpu.dot_dimension_numbers<[1], [0], [0], [1], [0, 0, 1, 1], [], []>} : vector<8x8xf32>, vector<8x32xf32>, vector<8x32xf32> -> vector<8x32xf32>
    %82 = arith.addf %79, %81 : vector<8x32xf32>
    %c9 = arith.constant 9 : index
    %c0_39 = arith.constant 0 : index
    %83 = vector.load %arg9[%c9, %c0_39] : memref<16x128xf32, #tpu.memory_space<vmem>>, vector<1x32xf32>
    %84 = vector.broadcast %83 : vector<1x32xf32> to vector<8x32xf32>
    %85 = arith.addf %82, %84 : vector<8x32xf32>
    %cst_40 = arith.constant 0.000000e+00 : f32
    %86 = vector.broadcast %cst_40 : f32 to vector<8x32xf32>
    %87 = arith.maximumf %85, %86 : vector<8x32xf32>
    %c0_41 = arith.constant 0 : index
    %c0_42 = arith.constant 0 : index
    %88 = vector.load %arg7[%c0_41, %c0_42] : memref<32x64xf32, #tpu.memory_space<vmem>>, vector<32x64xf32>
    %cst_43 = arith.constant dense<0.000000e+00> : vector<8x64xf32>
    %89 = tpu.matmul %87, %88, %cst_43 {dimension_numbers = #tpu.dot_dimension_numbers<[1], [0], [0], [1], [0, 0, 1, 1], [], []>} : vector<8x32xf32>, vector<32x64xf32>, vector<8x64xf32> -> vector<8x64xf32>
    %c10 = arith.constant 10 : index
    %c0_44 = arith.constant 0 : index
    %90 = vector.load %arg9[%c10, %c0_44] : memref<16x128xf32, #tpu.memory_space<vmem>>, vector<1x64xf32>
    %91 = vector.broadcast %90 : vector<1x64xf32> to vector<8x64xf32>
    %92 = arith.addf %89, %91 : vector<8x64xf32>
    %cst_45 = arith.constant 0.000000e+00 : f32
    %93 = vector.broadcast %cst_45 : f32 to vector<8x64xf32>
    %94 = arith.maximumf %92, %93 : vector<8x64xf32>
    %c0_46 = arith.constant 0 : index
    %c0_47 = arith.constant 0 : index
    %95 = vector.load %arg8[%c0_46, %c0_47] : memref<64x128xf32, #tpu.memory_space<vmem>>, vector<64x128xf32>
    %cst_48 = arith.constant dense<0.000000e+00> : vector<8x128xf32>
    %96 = tpu.matmul %94, %95, %cst_48 {dimension_numbers = #tpu.dot_dimension_numbers<[1], [0], [0], [1], [0, 0, 1, 1], [], []>} : vector<8x64xf32>, vector<64x128xf32>, vector<8x128xf32> -> vector<8x128xf32>
    %c11 = arith.constant 11 : index
    %c0_49 = arith.constant 0 : index
    %97 = vector.load %arg9[%c11, %c0_49] : memref<16x128xf32, #tpu.memory_space<vmem>>, vector<1x128xf32>
    %98 = vector.broadcast %97 : vector<1x128xf32> to vector<8x128xf32>
    %99 = arith.addf %96, %98 : vector<8x128xf32>
    %c0_50 = arith.constant 0 : index
    %c0_51 = arith.constant 0 : index
    %100 = vector.load %arg11[%c0_50, %c0_51] : memref<8x128xf32, #tpu.memory_space<vmem>>, vector<8x128xf32>
    tpu.vector_store %arg11[%c0_50, %c0_51], %99 {strides = array<i32>} : memref<8x128xf32, #tpu.memory_space<vmem>>, vector<8x128xf32>,
    return
  }
  func.func @transform_0(%arg0: i32) -> (i32, i32) {
    %c0_i32 = arith.constant 0 : i32
    %c0_i32_0 = arith.constant 0 : i32
    %c0_i32_1 = arith.constant 0 : i32
    return %c0_i32, %c0_i32_0 : i32, i32
  }
  func.func @transform_1(%arg0: i32) -> (i32, i32) {
    %c0_i32 = arith.constant 0 : i32
    %c0_i32_0 = arith.constant 0 : i32
    %c0_i32_1 = arith.constant 0 : i32
    return %c0_i32, %c0_i32_0 : i32, i32
  }
  func.func @transform_2(%arg0: i32) -> (i32, i32) {
    %c0_i32 = arith.constant 0 : i32
    %c0_i32_0 = arith.constant 0 : i32
    %c0_i32_1 = arith.constant 0 : i32
    return %c0_i32, %c0_i32_0 : i32, i32
  }
  func.func @transform_3(%arg0: i32) -> (i32, i32) {
    %c0_i32 = arith.constant 0 : i32
    %c0_i32_0 = arith.constant 0 : i32
    %c0_i32_1 = arith.constant 0 : i32
    return %c0_i32, %c0_i32_0 : i32, i32
  }
  func.func @transform_4(%arg0: i32) -> (i32, i32) {
    %c0_i32 = arith.constant 0 : i32
    %c0_i32_0 = arith.constant 0 : i32
    %c0_i32_1 = arith.constant 0 : i32
    return %c0_i32, %c0_i32_0 : i32, i32
  }
  func.func @transform_5(%arg0: i32) -> (i32, i32) {
    %c0_i32 = arith.constant 0 : i32
    %c0_i32_0 = arith.constant 0 : i32
    %c0_i32_1 = arith.constant 0 : i32
    return %c0_i32, %c0_i32_0 : i32, i32
  }
  func.func @transform_6(%arg0: i32) -> (i32, i32) {
    %c0_i32 = arith.constant 0 : i32
    %c0_i32_0 = arith.constant 0 : i32
    %c0_i32_1 = arith.constant 0 : i32
    return %c0_i32, %c0_i32_0 : i32, i32
  }
  func.func @transform_7(%arg0: i32) -> (i32, i32) {
    %c0_i32 = arith.constant 0 : i32
    %c0_i32_0 = arith.constant 0 : i32
    %c0_i32_1 = arith.constant 0 : i32
    return %c0_i32, %c0_i32_0 : i32, i32
  }
  func.func @transform_8(%arg0: i32) -> (i32, i32) {
    %c0_i32 = arith.constant 0 : i32
    %c0_i32_0 = arith.constant 0 : i32
    %c0_i32_1 = arith.constant 0 : i32
    return %c0_i32, %c0_i32_0 : i32, i32
  }
  func.func @transform_9(%arg0: i32) -> (i32, i32) {
    %c0_i32 = arith.constant 0 : i32
    %c0_i32_0 = arith.constant 0 : i32
    %c0_i32_1 = arith.constant 0 : i32
    return %c0_i32, %c0_i32_0 : i32, i32
  }
  func.func @transform_10(%arg0: i32) -> (i32, i32) {
    %c0_i32 = arith.constant 0 : i32
    %c0_i32_0 = arith.constant 0 : i32
    %c0_i32_1 = arith.constant 0 : i32
    return %c0_i32, %c0_i32_0 : i32, i32
  }
}

</mosaic_0001>

<bundles_post_ra>
// kernel: tpu_custom_call.1
= control target key start
LH: loop header
LB: loop body
LE: loop exit
PB: predicated region body
PF: predicated region fallthrough
CT: control target
= control target key end

     0   :  { %16 = vsyncpa [#allocation3], 0  ;;  %s1569_s0 = inlined_call_operand.hbm [shape: f32[8,32], index: 0, kind: input, shape index: {}]   ;;  %s1570_s1 = inlined_call_operand.hbm [shape: f32[32,64], index: 1, kind: input, shape index: {}]   ;;  %s1571_s2 = inlined_call_operand.hbm [shape: f32[64,64], index: 2, kind: input, shape index: {}]   ;;  %s1572_s3 = inlined_call_operand.hbm [shape: f32[64,128], index: 3, kind: input, shape index: {}]   ;;  %s1573_s4 = inlined_call_operand.hbm [shape: f32[32,32], index: 4, kind: input, shape index: {}]   ;;  %s1574_s5 = inlined_call_operand.vmem [shape: f32[8,32], index: 5, kind: input, shape index: {}]   ;;  %s1575_s6 = inlined_call_operand.hbm [shape: f32[32,64], index: 6, kind: input, shape index: {}]   ;;  %s1576_s7 = inlined_call_operand.hbm [shape: f32[64,128], index: 7, kind: input, shape index: {}]   ;;  %s1577_s8 = inlined_call_operand.vmem [shape: f32[16,128], index: 8, kind: input, shape index: {}]   ;;  %s1578_s9 = inlined_call_operand.hbm [shape: f32[8,128], index: 9, kind: output, shape index: {0}]   ;;  %s1579_s10 = inlined_call_operand.hbm [shape: f32[8,128], index: 10, kind: output, shape index: {1}]  }
   0x1   :  { %17 = vsyncpa [#allocation6], 0 }
   0x2   :  { %18 = vsyncpa [#allocation9], 0 }
   0x3   :  { %19 = vsyncpa [#allocation12], 0 }
   0x4   :  { %20 = vsyncpa [#allocation4], 0 }
   0x5   :  { %21 = vsyncpa [#allocation16], 0  ;;  %s1272_s13 = smov [#allocation5]   ;;  %s1062_s17 = scalar_lea.hbm %s1570_s1, 512 }
   0x6   :  { %s37_s14 = sshll.u32 %s1272_s13, 4  ;;  %p1063_p0 = scmp.ne.s32.totalorder %s1570_s1, %s1062_s17  ;;  %s38_s14 = int_to_ptr.vmem [resolvable:$true] %s37_s14 }
   0x7   :  { %p1066_p1 = scmp.lt.u32.totalorder %s1062_s17, %s1570_s1 }
   0x9   :  { %p1068_p2 = pnand %p1066_p1, %p1063_p0 }
   0xb   :  { %1071 = shalt.err (!%p1068_p2)
}
   0xc   :  { %s1072_s22 = scalar_lea.vmem %s38_s14, 512  ;;  %p1077_p4 = scmp.lt.s32.totalorder %s38_s14, %s38_s14 }
   0xd   :  { %p1073_p3 = scmp.ne.s32.totalorder %s38_s14, %s1072_s22  ;;  %p1078_p5 = scmp.lt.s32.totalorder %s1072_s22, %s1072_s22 }
   0xf   :  { %p1079_p6 = por %p1078_p5, %p1077_p4 }
  0x11   :  { %p1080_p7 = pnand %p1079_p6, %p1073_p3 }
  0x13   :  { %1083 = shalt.err (!%p1080_p7)
}
  0x14   :  { %s1273_s23 = smov 128   ;;  %s1274_s24 = smov 8  }
  0x15   :  { %43 = dma.hbm_to_vmem [thread:$0]  %s1570_s1, 512, %s38_s14, [#allocation6], %s1273_s23, %s1273_s23, %s1274_s24  }
  0x16   :  { %s1275_s27 = smov [#allocation8]   ;;  %s1276_s29 = smov [#allocation11]  }
  0x17   :  { %s61_s28 = sshll.u32 %s1275_s27, 4  ;;  %s87_s30 = sshll.u32 %s1276_s29, 4  ;;  %s62_s28 = int_to_ptr.vmem [resolvable:$true] %s61_s28  ;;  %s88_s30 = int_to_ptr.vmem [resolvable:$true] %s87_s30 }
  0x18   :  { %s1084_s13 = scalar_lea.hbm %s1572_s3, 1024 }
  0x19   :  { %p1085_p8 = scmp.ne.s32.totalorder %s1572_s3, %s1084_s13  ;;  %p1088_p9 = scmp.lt.u32.totalorder %s1084_s13, %s1572_s3 }
  0x1b   :  { %p1090_p10 = pnand %p1088_p9, %p1085_p8 }
  0x1d   :  { %1093 = shalt.err (!%p1090_p10)
}
  0x1e   :  { %s1094_s1 = scalar_lea.vmem %s62_s28, 1024  ;;  %p1099_p12 = scmp.lt.s32.totalorder %s62_s28, %s62_s28 }
  0x1f   :  { %p1095_p11 = scmp.ne.s32.totalorder %s62_s28, %s1094_s1  ;;  %p1100_p13 = scmp.lt.s32.totalorder %s1094_s1, %s1094_s1 }
  0x21   :  { %p1101_p0 = por %p1100_p13, %p1099_p12 }
  0x23   :  { %p1102_p1 = pnand %p1101_p0, %p1095_p11 }
  0x25   :  { %1105 = shalt.err (!%p1102_p1)
}
  0x26   :  { %67 = dma.hbm_to_vmem [thread:$0]  %s1572_s3, 1024, %s62_s28, [#allocation9], %s1273_s23, %s1273_s23, %s1274_s24  }
  0x27   :  { %s1106_s22 = scalar_lea.hbm %s1575_s6, 512 }
  0x28   :  { %p1107_p2 = scmp.ne.s32.totalorder %s1575_s6, %s1106_s22  ;;  %p1110_p3 = scmp.lt.u32.totalorder %s1106_s22, %s1575_s6 }
  0x2a   :  { %p1112_p4 = pnand %p1110_p3, %p1107_p2 }
  0x2c   :  { %1115 = shalt.err (!%p1112_p4)
}
  0x2d   :  { %s1116_s11 = scalar_lea.vmem %s88_s30, 512  ;;  %p1121_p6 = scmp.lt.s32.totalorder %s88_s30, %s88_s30 }
  0x2e   :  { %p1117_p5 = scmp.ne.s32.totalorder %s88_s30, %s1116_s11  ;;  %p1122_p7 = scmp.lt.s32.totalorder %s1116_s11, %s1116_s11 }
  0x30   :  { %p1123_p8 = por %p1122_p7, %p1121_p6 }
  0x32   :  { %p1124_p9 = pnand %p1123_p8, %p1117_p5 }
  0x34   :  { %1127 = shalt.err (!%p1124_p9)
}
  0x35   :  { %93 = dma.hbm_to_vmem [thread:$0]  %s1575_s6, 512, %s88_s30, [#allocation12], %s1273_s23, %s1273_s23, %s1274_s24  }
  0x36   :  { %s1277_s12 = smov [#allocation2]   ;;  %s1278_s15 = smov [#allocation7]  }
  0x37   :  { %s28_s13 = sshll.u32 %s1277_s12, 4  ;;  %s49_s16 = sshll.u32 %s1278_s15, 4  ;;  %s29_s13 = int_to_ptr.vmem [resolvable:$true] %s28_s13  ;;  %s50_s16 = int_to_ptr.vmem [resolvable:$true] %s49_s16 }
  0x38   :  { %s1128_s1 = scalar_lea.hbm %s1569_s0, 128 }
  0x39   :  { %p1129_p10 = scmp.ne.s32.totalorder %s1569_s0, %s1128_s1  ;;  %p1132_p11 = scmp.lt.u32.totalorder %s1128_s1, %s1569_s0 }
  0x3b   :  { %p1134_p12 = pnand %p1132_p11, %p1129_p10 }
  0x3d   :  { %1137 = shalt.err (!%p1134_p12)
}
  0x3e   :  { %s1138_s6 = scalar_lea.vmem %s29_s13, 128  ;;  %p1143_p0 = scmp.lt.s32.totalorder %s29_s13, %s29_s13 }
  0x3f   :  { %p1139_p13 = scmp.ne.s32.totalorder %s29_s13, %s1138_s6  ;;  %p1144_p1 = scmp.lt.s32.totalorder %s1138_s6, %s1138_s6 }
  0x41   :  { %p1145_p2 = por %p1144_p1, %p1143_p0 }
  0x43   :  { %p1146_p3 = pnand %p1145_p2, %p1139_p13 }
  0x45   :  { %1149 = shalt.err (!%p1146_p3)
}
  0x46   :  { %31 = dma.hbm_to_vmem [thread:$0]  %s1569_s0, 128, %s29_s13, [#allocation3]  }
  0x47   :  { %s1150_s27 = scalar_lea.hbm %s1571_s2, 1024 }
  0x48   :  { %p1151_p4 = scmp.ne.s32.totalorder %s1571_s2, %s1150_s27  ;;  %p1154_p5 = scmp.lt.u32.totalorder %s1150_s27, %s1571_s2 }
  0x4a   :  { %p1156_p6 = pnand %p1154_p5, %p1151_p4 }
  0x4c   :  { %1159 = shalt.err (!%p1156_p6)
}
  0x4d   :  { %s1160_s12 = scalar_lea.vmem %s50_s16, 1024  ;;  %p1165_p8 = scmp.lt.s32.totalorder %s50_s16, %s50_s16 }
  0x4e   :  { %p1161_p7 = scmp.ne.s32.totalorder %s50_s16, %s1160_s12  ;;  %p1166_p9 = scmp.lt.s32.totalorder %s1160_s12, %s1160_s12 }
  0x50   :  { %p1167_p10 = por %p1166_p9, %p1165_p8 }
  0x52   :  { %p1168_p11 = pnand %p1167_p10, %p1161_p7 }
  0x54   :  { %1171 = shalt.err (!%p1168_p11)
}
  0x55   :  { %55 = dma.hbm_to_vmem [thread:$0]  %s1571_s2, 1024, %s50_s16, [#allocation6], %s1273_s23, %s1273_s23, %s1274_s24  }
  0x56   :  { %s1279_s15 = smov [#allocation10]   ;;  %s1280_s18 = smov [#allocation13]  }
  0x57   :  { %s73_s17 = sshll.u32 %s1279_s15, 4  ;;  %s99_s1 = sshll.u32 %s1280_s18, 4  ;;  %s74_s17 = int_to_ptr.vmem [resolvable:$true] %s73_s17  ;;  %s100_s1 = int_to_ptr.vmem [resolvable:$true] %s99_s1 }
  0x58   :  { %s1172_s20 = scalar_lea.hbm %s1573_s4, 512 }
  0x59   :  { %p1173_p12 = scmp.ne.s32.totalorder %s1573_s4, %s1172_s20  ;;  %p1176_p13 = scmp.lt.u32.totalorder %s1172_s20, %s1573_s4 }
  0x5b   :  { %p1178_p0 = pnand %p1176_p13, %p1173_p12 }
  0x5d   :  { %1181 = shalt.err (!%p1178_p0)
}
  0x5e   :  { %s1182_s2 = scalar_lea.vmem %s74_s17, 512  ;;  %p1187_p2 = scmp.lt.s32.totalorder %s74_s17, %s74_s17 }
  0x5f   :  { %p1183_p1 = scmp.ne.s32.totalorder %s74_s17, %s1182_s2  ;;  %p1188_p3 = scmp.lt.s32.totalorder %s1182_s2, %s1182_s2 }
  0x61   :  { %p1189_p4 = por %p1188_p3, %p1187_p2 }
  0x63   :  { %p1190_p5 = pnand %p1189_p4, %p1183_p1 }
  0x65   :  { %1193 = shalt.err (!%p1190_p5)
}
  0x66   :  { %79 = dma.hbm_to_vmem [thread:$0]  %s1573_s4, 512, %s74_s17, [#allocation9], %s1273_s23, %s1273_s23, %s1274_s24  }
  0x67   :  { %s1194_s29 = scalar_lea.hbm %s1576_s7, 1024 }
  0x68   :  { %p1195_p6 = scmp.ne.s32.totalorder %s1576_s7, %s1194_s29  ;;  %p1198_p7 = scmp.lt.u32.totalorder %s1194_s29, %s1576_s7 }
  0x6a   :  { %p1200_p8 = pnand %p1198_p7, %p1195_p6 }
  0x6c   :  { %1203 = shalt.err (!%p1200_p8)
}
  0x6d   :  { %s1204_s0 = scalar_lea.vmem %s100_s1, 1024  ;;  %p1209_p10 = scmp.lt.s32.totalorder %s100_s1, %s100_s1 }
  0x6e   :  { %p1205_p9 = scmp.ne.s32.totalorder %s100_s1, %s1204_s0  ;;  %p1210_p11 = scmp.lt.s32.totalorder %s1204_s0, %s1204_s0 }
  0x70   :  { %p1211_p12 = por %p1210_p11, %p1209_p10 }
  0x72   :  { %p1212_p13 = pnand %p1211_p12, %p1205_p9 }
  0x74   :  { %1215 = shalt.err (!%p1212_p13)
}
  0x75   :  { %105 = dma.hbm_to_vmem [thread:$0]  %s1576_s7, 1024, %s100_s1, [#allocation12], %s1273_s23, %s1273_s23, %s1274_s24  }
  0x76   :  { %1260 = dma.done.wait [#allocation3], 128  }
  0x77   :  { %1261 = vsyncadd [#allocation3], 4294967168 }
  0x78   :  { %1262 = dma.done.wait [#allocation6], 1536  }
  0x79   :  { %1263 = vsyncadd [#allocation6], 4294965760 }
  0x7a   :  { %1264 = dma.done.wait [#allocation9], 1536  }
  0x7b   :  { %1265 = vsyncadd [#allocation9], 4294965760 }
  0x7c   :  { %1266 = dma.done.wait [#allocation12], 1536  }
  0x7d   :  { %1267 = vsyncadd [#allocation12], 4294965760  ;;  %v1281_v0 = vmov 0.0|0.0   ;;  %vm1282_vm0 = vmmov 0   ;;  %v1283_v1 = vmov 0.0   ;;  %vm130_vm1 = vcmask 261120  }
  0x7e   :  { %988 = vmatprep.subr.bf16.mxu0 %v1281_v0  ;;  %901 = vmatprep.mubr.msk.f32.mxu0 %vm1282_vm0, %v1283_v1  ;;  %v166_v2 = vld [vmem:[#allocation5] sm:$0xff]  ;;  %v167_v3 = vld [vmem:[#allocation5 + $0x8] sm:$0xff]  ;;  %v168_v4 = vld [vmem:[#allocation5 + $0x10] sm:$0xff]  ;;  %v153_v37 = vlaneseq  ;;  %vm262_vm2 = vcmask 523264   ;;  %vm425_vm3 = vcmask 64512   ;;  %s1284_s12 = smov [#allocation14]  }
  0x7f   :  { %994 = vmatprep.subr.bf16.mxu1 %v1281_v0  ;;  %920 = vmatprep.mubr.msk.f32.mxu1 %vm1282_vm0, %v1283_v1  ;;  %v989_v5 = vpack.c.bf16 %v167_v3, %v166_v2  ;;  %v169_v6 = vld [vmem:[#allocation5 + $0x18] sm:$0xff]  ;;  %v249_v9 = vld [vmem:[#allocation7] sm:$0xff]  ;;  %v250_v10 = vld [vmem:[#allocation7 + $0x8] sm:$0xff]  ;;  %s810_s0 = sshll.u32 %s1284_s12, 4  ;;  %s811_s0 = int_to_ptr.vmem [resolvable:$true] %s810_s0 }
  0x80   :  { %v1449_v7 = vld [vmem:[#allocation2] sm:$0xff]  ;;  %v992_v11 = vpack.c.bf16 %v169_v6, %v168_v4  ;;  %v995_v13 = vpack.c.bf16 %v250_v10, %v249_v9  ;;  %v251_v14 = vld [vmem:[#allocation7 + $0x10] sm:$0xff]  ;;  %v253_v18 = vld [vmem:[#allocation7 + $0x20] sm:$0xff]  ;;  %v154_v38 = vshrl.u32 %v153_v37, 7  ;;  %s1216_s4 = scalar_lea.vmem %s811_s0, 128  ;;  %p1221_p1 = scmp.lt.s32.totalorder %s811_s0, %s811_s0 }
  0x81   :  { %v131_v8 = vsel %vm130_vm1, %v1449_v7, 0.0  ;;  %990 = vmatpush3.bf16.msra.mxu0 %v989_v5  ;;  %v252_v15 = vld [vmem:[#allocation7 + $0x18] sm:$0xff]  ;;  %v254_v19 = vld [vmem:[#allocation7 + $0x28] sm:$0xff]  ;;  %v255_v50 = vld [vmem:[#allocation7 + $0x30] sm:$0xff]  ;;  %p1217_p0 = scmp.ne.s32.totalorder %s811_s0, %s1216_s4  ;;  %p1222_p2 = scmp.lt.s32.totalorder %s1216_s4, %s1216_s4 }
  0x82   :  { %v132_v12 = vrot.slane %v131_v8, 4  ;;  %991 = vmatprep.subr.bf16.mxu0 %v1281_v0  ;;  %996 = vmatpush3.bf16.msra.mxu1 %v995_v13  ;;  %v998_v17 = vpack.c.bf16 %v252_v15, %v251_v14  ;;  %v1001_v22 = vpack.c.bf16 %v254_v19, %v253_v18  ;;  %v151_v39 = vld [vmem:[%s1577_s8] sm:$0x1]  ;;  %v1466_v40 = vsub.s32 0, %v154_v38  ;;  %v158_v43 = vld [vmem:[%s1577_s8 + $0x1] sm:$0x1] }
  0x83   :  { %997 = vmatprep.subr.bf16.mxu1 %v1281_v0  ;;  %v256_v51 = vld [vmem:[#allocation7 + $0x38] sm:$0xff]  ;;  %v337_v53 = vld [vmem:[#allocation8] sm:$0xff]  ;;  %v338_v54 = vld [vmem:[#allocation8 + $0x8] sm:$0xff]  ;;  %p1223_p3 = por %p1222_p2, %p1221_p1 }
  0x84   :  { %v133_v16 = vadd.f32 %v132_v12, %v131_v8  ;;  %v1004_v52 = vpack.c.bf16 %v256_v51, %v255_v50  ;;  %v339_v55 = vld [vmem:[#allocation8 + $0x10] sm:$0xff]  ;;  %v1007_v56 = vpack.c.bf16 %v338_v54, %v337_v53  ;;  %v340_v57 = vld [vmem:[#allocation8 + $0x18] sm:$0xff]  ;;  %v341_v59 = vld [vmem:[#allocation8 + $0x20] sm:$0xff] }
  0x85   :  { %993 = vmatpush3.bf16.msra.mxu0 %v992_v11  ;;  %v1010_v58 = vpack.c.bf16 %v340_v57, %v339_v55  ;;  %v342_v60 = vld [vmem:[#allocation8 + $0x28] sm:$0xff]  ;;  %v343_v5 = vld [vmem:[#allocation8 + $0x30] sm:$0xff]  ;;  %v344_v6 = vld [vmem:[#allocation8 + $0x38] sm:$0xff]  ;;  %p1224_p4 = pnand %p1223_p3, %p1217_p0 }
  0x86   :  { %v134_v20 = vrot.slane %v133_v16, 2  ;;  %1006 = vmatprep.subr.bf16.mxu0 %v1281_v0  ;;  %999 = vmatpush3.bf16.msra.mxu1 %v998_v17  ;;  %v1013_v61 = vpack.c.bf16 %v342_v60, %v341_v59  ;;  %v836_v62 = vld [vmem:[%s1577_s8 + $0x6] ss:$0 sm:$0xff]  ;;  %v1016_v8 = vpack.c.bf16 %v344_v6, %v343_v5  ;;  %v838_v9 = vld [vmem:[%s1577_s8 + $0x7] ss:$0 sm:$0xff]  ;;  %v476_v14 = vld [vmem:[#allocation10] sm:$0xff] }
  0x87   :  { %1000 = vmatprep.subr.bf16.mxu1 %v1281_v0  ;;  %v477_v15 = vld [vmem:[#allocation10 + $0x8] sm:$0xff]  ;;  %v478_v18 = vld [vmem:[#allocation10 + $0x10] sm:$0xff]  ;;  %v479_v19 = vld [vmem:[#allocation10 + $0x18] sm:$0xff] }
  0x88   :  { %v135_v21 = vadd.f32 %v134_v20, %v133_v16  ;;  %v480_v16 = vld [vmem:[%s1574_s5] sm:$0xff]  ;;  %v1019_v17 = vpack.c.bf16 %v477_v15, %v476_v14  ;;  %v720_v14 = vld [vmem:[#allocation13 + $0x18] sm:$0xff] }
  0x89   :  { %v446_v20 = vld [vmem:[%s1577_s8 + $0x2] sm:$0x1]  ;;  %v461_v54 = vld [vmem:[%s1577_s8 + $0x3] sm:$0x1]  ;;  %v468_v57 = vld [vmem:[%s1577_s8 + $0x5] sm:$0x1] }
  0x8a   :  { %v136_v23 = vrot.slane %v135_v21, 1  ;;  %1002 = vmatpush3.bf16.msra.mxu1 %v1001_v22  ;;  %v1022_v22 = vpack.c.bf16 %v479_v19, %v478_v18  ;;  %v635_v5 = vld [vmem:[#allocation11 + $0x8] sm:$0xff]  ;;  %v844_v19 = vld [vmem:[%s1577_s8 + $0x9] ss:$0 sm:$0xff] }
  0x8b   :  { %1003 = vmatprep.subr.bf16.mxu1 %v1281_v0 }
  0x8c   :  { %v137_v24 = vadd.f32 %v136_v23, %v135_v21  ;;  %v453_v23 = vld [vmem:[%s1577_s8 + $0x4] sm:$0x1] }
  0x8e   :  { %v1458_v25 = vmul.f32 0.125, %v137_v24  ;;  %1005 = vmatpush3.bf16.msra.mxu1 %v1004_v52 }
  0x8f   :  { %1018 = vmatprep.subr.bf16.mxu1 %v1281_v0 }
  0x90   :  { %v139_v26 = vsub.f32 %v1449_v7, %v1458_v25 }
  0x92   :  { %v140_v27 = vmul.f32 %v139_v26, %v139_v26 }
  0x94   :  { %v141_v28 = vsel %vm130_vm1, %v140_v27, 0.0 }
  0x95   :  { %v142_v29 = vrot.slane %v141_v28, 4 }
  0x97   :  { %v143_v30 = vadd.f32 %v142_v29, %v141_v28 }
  0x99   :  { %v144_v31 = vrot.slane %v143_v30, 2 }
  0x9b   :  { %v145_v32 = vadd.f32 %v144_v31, %v143_v30  ;;  %v840_v31 = vld [vmem:[%s1577_s8 + $0x8] ss:$0 sm:$0xff] }
  0x9d   :  { %v146_v33 = vrot.slane %v145_v32, 1 }
  0x9f   :  { %v147_v34 = vadd.f32 %v146_v33, %v145_v32 }
  0xa1   :  { %v148_v35 = vmul.f32 0.125, %v147_v34 }
  0xa3   :  { %v149_v36 = vadd.f32 1e-05, %v148_v35 }
  0xa5   :  { %1056 = vrsqrt.f32 %v149_v36 }
  0xaf   :  { %v1057_v41 = vpop.eup %1056 }
  0xb0   :  { %v152_v42 = vmul.f32 %v1057_v41, %v151_v39  ;;  %v447_v21 = vmul.f32 %v1057_v41, %v446_v20 }
  0xb2   :  { %v156_v44 = vrot.slane %v152_v42, %v1466_v40  ;;  %v159_v45 = vmul.f32 %v152_v42, %v1458_v25  ;;  %v451_v24 = vrot.slane %v447_v21, %v1466_v40  ;;  %v454_v26 = vmul.f32 %v447_v21, %v1458_v25 }
  0xb4   :  { %v157_v46 = vmul.f32 %v156_v44, %v1449_v7  ;;  %v160_v47 = vsub.f32 %v158_v43, %v159_v45  ;;  %v452_v27 = vmul.f32 %v451_v24, %v1449_v7  ;;  %v455_v28 = vsub.f32 %v453_v23, %v454_v26  ;;  %v723_v24 = vld [vmem:[#allocation13 + $0x30] sm:$0xff]  ;;  %v724_v26 = vld [vmem:[#allocation13 + $0x38] sm:$0xff] }
  0xb6   :  { %v164_v48 = vrot.slane %v160_v47, %v1466_v40  ;;  %v459_v29 = vrot.slane %v455_v28, %v1466_v40  ;;  %v845_v28 = vld [vmem:[%s1577_s8 + $0xa] ss:$0 sm:$0xff] }
  0xb8   :  { %v165_v49 = vadd.f32 %v164_v48, %v157_v46  ;;  %v460_v30 = vadd.f32 %v459_v29, %v452_v27  ;;  %v1040_v27 = vpack.c.bf16 %v724_v26, %v723_v24 }
  0xba   :  { %902 = vmatmul.mubr.msk.f32.vlgmr.msra.gmra.mrb[0].mxu0 %vm130_vm1, %v165_v49 }
  0xbb   :  { %939 = vmatprep.mubr.msk.f32.mxu0 %vm1282_vm0, %v1283_v1  ;;  %1008 = vmatpush3.bf16.msra.mxu0 %v1007_v56 }
  0xbc   :  { %1009 = vmatprep.subr.bf16.mxu0 %v1281_v0 }
  0xbf   :  { %1011 = vmatpush3.bf16.msra.mxu0 %v1010_v58 }
  0xc0   :  { %1012 = vmatprep.subr.bf16.mxu0 %v1281_v0 }
  0xc3   :  { %1014 = vmatpush3.bf16.msra.mxu0 %v1013_v61 }
  0xc4   :  { %1015 = vmatprep.subr.bf16.mxu0 %v1281_v0 }
  0xc7   :  { %1017 = vmatpush3.bf16.msra.mxu0 %v1016_v8  ;;  %v636_v8 = vld [vmem:[#allocation11 + $0x10] sm:$0xff] }
  0xc8   :  { %942 = vmatprep.subr.mxu0 %v1283_v1 }
 0x18d   :  { %v244_v63 = vpop.f32.mrb[0].mxu0 }
 0x18e   :  { %v245_v2 = vadd.f32 %v836_v62, %v244_v63  ;;  %v903_v3 = vpop.f32.mrb[1].mxu0 }
 0x190   :  { %v248_v4 = vmax.f32 %v245_v2, 0.0 }
 0x192   :  { %921 = vmatmul.mubr.msk.f32.vlgmr.msra.gmra.mrb[0].mxu1 %vm262_vm2, %v248_v4  ;;  %v634_v4 = vld [vmem:[#allocation11] sm:$0xff] }
 0x193   :  { %955 = vmatprep.mubr.msk.f32.mxu1 %vm1282_vm0, %v1283_v1  ;;  %1020 = vmatpush3.bf16.msra.mxu1 %v1019_v17  ;;  %v1025_v6 = vpack.c.bf16 %v635_v5, %v634_v4 }
 0x194   :  { %1021 = vmatprep.subr.bf16.mxu1 %v1281_v0 }
 0x197   :  { %1023 = vmatpush3.bf16.msra.mxu1 %v1022_v22 }
 0x198   :  { %1030 = vmatprep.subr.bf16.mxu1 %v1281_v0 }
 0x19a   :  { %956 = vmatmul.mubr.msk.f32.vlgmr.msra.gmra.mrb[2].mxu1 %vm130_vm1, %v460_v30 }
 0x19b   :  { %985 = vmatprep.mubr.msk.f32.mxu1 %vm1282_vm0, %v1283_v1 }
 0x265   :  { %v332_v10 = vpop.f32.mrb[0].mxu1 }
 0x266   :  { %v333_v11 = vadd.f32 %v838_v9, %v332_v10  ;;  %v922_v12 = vpop.f32.mrb[1].mxu1  ;;  %v637_v9 = vld [vmem:[#allocation11 + $0x18] sm:$0xff] }
 0x267   :  { %v1028_v10 = vpack.c.bf16 %v637_v9, %v636_v8  ;;  %v719_v12 = vld [vmem:[#allocation13 + $0x10] sm:$0xff] }
 0x268   :  { %v336_v13 = vmax.f32 %v333_v11, 0.0  ;;  %v717_v11 = vld [vmem:[#allocation13] sm:$0xff]  ;;  %v1034_v15 = vpack.c.bf16 %v720_v14, %v719_v12 }
 0x26a   :  { %940 = vmatmul.mubr.msk.f32.vlgmr.msra.gmra.mrb[2].mxu0 %vm262_vm2, %v336_v13 }
 0x26b   :  { %944 = vmatprep.mubr.msk.f32.mxu0 %vm1282_vm0, %v1283_v1  ;;  %943 = vmatpush3.msra.mxu0 %v480_v16  ;;  %v722_v16 = vld [vmem:[#allocation13 + $0x28] sm:$0xff] }
 0x26c   :  { %1024 = vmatprep.subr.bf16.mxu0 %v1281_v0 }
 0x26d   :  { %v623_v2 = vpop.f32.mrb[2].mxu1 }
 0x26e   :  { %v957_v3 = vpop.f32.mrb[3].mxu1 }
 0x33d   :  { %v419_v32 = vpop.f32.mrb[2].mxu0 }
 0x33e   :  { %v420_v25 = vadd.f32 %v840_v31, %v419_v32  ;;  %v941_v33 = vpop.f32.mrb[3].mxu0 }
 0x340   :  { %1058 = vtanh.f32 %v420_v25 }
 0x34a   :  { %v1059_v7 = vpop.eup %1058 }
 0x34b   :  { %424 = vst [vmem:[#allocation14] sm:$0xff] %v1059_v7  ;;  %v426_v34 = vsel %vm425_vm3, %v1059_v7, 0.0 }
 0x34c   :  { %v427_v35 = vrot.slane %v426_v34, 4 }
 0x34e   :  { %v428_v36 = vadd.f32 %v427_v35, %v426_v34 }
 0x350   :  { %v429_v37 = vrot.slane %v428_v36, 2 }
 0x352   :  { %v430_v38 = vadd.f32 %v429_v37, %v428_v36 }
 0x354   :  { %v431_v39 = vrot.slane %v430_v38, 1 }
 0x356   :  { %v432_v41 = vadd.f32 %v431_v39, %v430_v38 }
 0x358   :  { %v433_v42 = vmul.f32 0.125, %v432_v41 }
 0x35a   :  { %v434_v43 = vsub.f32 %v1059_v7, %v433_v42 }
 0x35c   :  { %v435_v44 = vmul.f32 %v434_v43, %v434_v43 }
 0x35e   :  { %v436_v45 = vsel %vm425_vm3, %v435_v44, 0.0 }
 0x35f   :  { %v437_v46 = vrot.slane %v436_v45, 4 }
 0x361   :  { %v438_v47 = vadd.f32 %v437_v46, %v436_v45 }
 0x363   :  { %v439_v48 = vrot.slane %v438_v47, 2 }
 0x365   :  { %v440_v49 = vadd.f32 %v439_v48, %v438_v47 }
 0x367   :  { %v441_v50 = vrot.slane %v440_v49, 1 }
 0x369   :  { %v442_v51 = vadd.f32 %v441_v50, %v440_v49 }
 0x36b   :  { %v443_v52 = vmul.f32 0.125, %v442_v51 }
 0x36d   :  { %v444_v53 = vadd.f32 1e-05, %v443_v52 }
 0x36f   :  { %1060 = vrsqrt.f32 %v444_v53 }
 0x379   :  { %v1061_v55 = vpop.eup %1060 }
 0x37a   :  { %v462_v56 = vmul.f32 %v1061_v55, %v461_v54 }
 0x37c   :  { %v466_v58 = vrot.slane %v462_v56, %v1466_v40  ;;  %v469_v59 = vmul.f32 %v462_v56, %v433_v42 }
 0x37e   :  { %v470_v60 = vsub.f32 %v468_v57, %v469_v59  ;;  %v467_v61 = vmul.f32 %v1059_v7, %v466_v58 }
 0x380   :  { %v474_v62 = vrot.slane %v470_v60, %v1466_v40  ;;  %v718_v40 = vld [vmem:[#allocation13 + $0x8] sm:$0xff] }
 0x381   :  { %v1031_v13 = vpack.c.bf16 %v718_v40, %v717_v11 }
 0x382   :  { %v475_v63 = vadd.f32 %v474_v62, %v467_v61 }
 0x383   :  { %1032 = vmatpush3.bf16.msra.mxu1 %v1031_v13 }
 0x384   :  { %945 = vmatmul.mubr.msk.f32.vlgmr.msra.gmra.mrb[4].mxu0 %vm425_vm3, %v475_v63  ;;  %1033 = vmatprep.subr.bf16.mxu1 %v1281_v0 }
 0x385   :  { %966 = vmatprep.mubr.msk.f32.mxu0 %vm1282_vm0, %v1283_v1  ;;  %1026 = vmatpush3.bf16.msra.mxu0 %v1025_v6  ;;  %v721_v1 = vld [vmem:[#allocation13 + $0x20] sm:$0xff] }
 0x386   :  { %1027 = vmatprep.subr.bf16.mxu0 %v1281_v0  ;;  %v1037_v17 = vpack.c.bf16 %v722_v16, %v721_v1 }
 0x387   :  { %1035 = vmatpush3.bf16.msra.mxu1 %v1034_v15 }
 0x388   :  { %1036 = vmatprep.subr.bf16.mxu1 %v1281_v0 }
 0x389   :  { %1029 = vmatpush3.bf16.msra.mxu0 %v1028_v10 }
 0x38b   :  { %1038 = vmatpush3.bf16.msra.mxu1 %v1037_v17 }
 0x38c   :  { %1039 = vmatprep.subr.bf16.mxu1 %v1281_v0 }
 0x38f   :  { %1041 = vmatpush3.bf16.msra.mxu1 %v1040_v27 }
 0x457   :  { %v550_v18 = vpop.f32.mrb[4].mxu0 }
 0x458   :  { %v624_v20 = vadd.f32 %v623_v2, %v550_v18  ;;  %v946_v21 = vpop.f32.mrb[5].mxu0 }
 0x45a   :  { %v632_v22 = vadd.f32 %v844_v19, %v624_v20 }
 0x45c   :  { %v633_v23 = vmax.f32 %v632_v22, 0.0 }
 0x45e   :  { %967 = vmatmul.mubr.msk.f32.vlgmr.msra.gmra.mrb[6].mxu0 %vm130_vm1, %v633_v23 }
 0x531   :  { %v712_v0 = vpop.f32.mrb[6].mxu0 }
 0x532   :  { %v713_v29 = vadd.f32 %v845_v28, %v712_v0  ;;  %v968_v30 = vpop.f32.mrb[7].mxu0 }
 0x534   :  { %v716_v31 = vmax.f32 %v713_v29, 0.0 }
 0x536   :  { %986 = vmatmul.mubr.msk.f32.vlgmr.msra.gmra.mrb[4].mxu1 %vm262_vm2, %v716_v31 }
 0x537   :  { %1227 = shalt.err (!%p1224_p4)
}
 0x538   :  { %s1228_s23 = scalar_lea.hbm %s1578_s9, 128 }
 0x539   :  { %p1229_p5 = scmp.ne.s32.totalorder %s1578_s9, %s1228_s23  ;;  %p1232_p6 = scmp.lt.u32.totalorder %s1228_s23, %s1578_s9 }
 0x53b   :  { %p1234_p7 = pnand %p1232_p6, %p1229_p5 }
 0x53d   :  { %1237 = shalt.err (!%p1234_p7)
}
 0x53e   :  { %813 = dma.vmem_to_hbm [thread:$0]  %s811_s0, 128, %s1578_s9, [#allocation4]   ;;  %v847_v32 = vld [vmem:[%s1577_s8 + $0xb] ss:$0 sm:$0xff] }
 0x53f   :  { %s1285_s21 = smov [#allocation15]  }
 0x540   :  { %s820_s6 = sshll.u32 %s1285_s21, 4  ;;  %s821_s6 = int_to_ptr.vmem [resolvable:$true] %s820_s6 }
 0x541   :  { %s1238_s30 = scalar_lea.vmem %s821_s6, 128  ;;  %p1243_p9 = scmp.lt.s32.totalorder %s821_s6, %s821_s6 }
 0x542   :  { %p1239_p8 = scmp.ne.s32.totalorder %s821_s6, %s1238_s30  ;;  %p1244_p10 = scmp.lt.s32.totalorder %s1238_s30, %s1238_s30 }
 0x544   :  { %p1245_p11 = por %p1244_p10, %p1243_p9 }
 0x546   :  { %p1246_p12 = pnand %p1245_p11, %p1239_p8 }
 0x609   :  { %v799_v25 = vpop.f32.mrb[4].mxu1 }
 0x60a   :  { %v800_v33 = vadd.f32 %v847_v32, %v799_v25  ;;  %v987_v7 = vpop.f32.mrb[5].mxu1 }
 0x60c   :  { %803 = vst [vmem:[#allocation15] sm:$0xff] %v800_v33 }
 0x60d   :  { %1249 = shalt.err (!%p1246_p12)
}
 0x60e   :  { %s1250_s5 = scalar_lea.hbm %s1579_s10, 128 }
 0x60f   :  { %p1251_p13 = scmp.ne.s32.totalorder %s1579_s10, %s1250_s5  ;;  %p1254_p0 = scmp.lt.u32.totalorder %s1250_s5, %s1579_s10 }
 0x611   :  { %p1256_p1 = pnand %p1254_p0, %p1251_p13 }
 0x613   :  { %1259 = shalt.err (!%p1256_p1)
}
 0x614   :  { %823 = dma.vmem_to_hbm [thread:$0]  %s821_s6, 128, %s1579_s10, [#allocation16]  }
 0x615   :  { %1268 = dma.done.wait [#allocation4], 128  }
 0x616   :  { %1269 = vsyncadd [#allocation4], 4294967168 }
 0x617   :  { %1270 = dma.done.wait [#allocation16], 128  }
 0x618   :  { %1271 = vsyncadd [#allocation16], 4294967168 }
 0x619   :  { %830 = vsyncpa [#allocation3], 1 }
 0x61a   :  { %831 = vsyncpa [#allocation6], 1 }
 0x61b   :  { %832 = vsyncpa [#allocation9], 1 }
 0x61c   :  { %833 = vsyncpa [#allocation12], 1 }
 0x61d   :  { %834 = vsyncpa [#allocation4], 1 }
 0x61e   :  { %835 = vsyncpa [#allocation16], 1 }

</bundles_post_ra>
